<compile_context>
chip_gen: v6e
topology: v6e:2x2x1
jax: 0.10.0
libtpu: 0.0.40
codegen_flags: <defaults>
</compile_context>

<pallas_src>
import functools

import jax
import jax.numpy as jnp
from jax.experimental import pallas as pl
from jax.experimental.pallas import tpu as pltpu


def _round_up(n, m):
    return ((n + m - 1) // m) * m


def _byte_mlp_kernel(x_ref, g_ref, w13_ref, w2_ref, o_ref, *, eps):
    H = w2_ref.shape[0]

    # Residual + all elementwise math in f32 (v5e has no bf16 VPU/EUP); MXU
    # operands cast to bf16 at the dot boundaries with f32 accumulation.
    x = x_ref[...].astype(jnp.float32)                         # (TN, D)

    # --- RMSNorm (f32, per-row) ---
    ms = jnp.mean(x * x, axis=-1, keepdims=True)               # (TN, 1)
    xn = x * jax.lax.rsqrt(ms + eps) * g_ref[...].astype(jnp.float32)

    # --- Fused gate/value projection: one (TN,D)x(D,2H) MXU dot ---
    proj = jnp.dot(xn.astype(jnp.bfloat16), w13_ref[...],
                   preferred_element_type=jnp.float32)          # (TN, 2H)
    gate = proj[:, :H]                                          # lane-aligned slice
    value = proj[:, H:]

    # silu(value) * sigmoid(gate) = value / ((1 + e^-value) * (1 + e^-gate))
    # -> 2 EUP exps + 1 approx EUP reciprocal (instead of two full sigmoids).
    denom = (1.0 + jnp.exp(-value)) * (1.0 + jnp.exp(-gate))
    h = value * pl.reciprocal(denom, approx=True)

    # --- Down projection + residual (residual add in f32) ---
    out = jnp.dot(h.astype(jnp.bfloat16), w2_ref[...],
                  preferred_element_type=jnp.float32) + x
    o_ref[...] = out.astype(o_ref.dtype)


@functools.partial(jax.jit, static_argnames=("eps", "token_tile"))
def byte_mlp_pallas(x, gamma, w13_t, w2_t, *, eps=1e-6, token_tile=512):
    """x: (B, S, D); gamma: (D,); w13_t: (D, 2H); w2_t: (H, D).

    Weights are pre-transposed (in_features, out_features) so the kernel
    computes y = x @ W (matches PyTorch y = x @ W.T). Output dtype == x.dtype,
    so passing bf16 activations halves streamed HBM bytes (v6e roofline win).
    """
    B, S, D = x.shape
    H = w2_t.shape[0]
    assert w13_t.shape == (D, 2 * H)
    assert token_tile % 8 == 0, "token_tile must be a multiple of 8 (sublanes)"

    # Cap for v7x's smaller VMEM (64 MiB physical / 32 MiB default scoped):
    # the (tn, 2H) f32 intermediates dominate per-tile VMEM usage.
    tile = min(token_tile, 2048)

    N = B * S
    x2d = x.reshape(N, D)                        # free view (contiguous)

    # Clamp the tile to the problem and let the grid be cdiv(N, tn): no
    # full-array pad / slice in the hot path.  The last (partial) block is
    # masked by Pallas; all math here is row-independent, so OOB rows are
    # harmless and their writes are discarded.
    tn = min(tile, _round_up(N, 8))
    n_blocks = pl.cdiv(N, tn)

    w13 = w13_t.astype(jnp.bfloat16)
    w2 = w2_t.astype(jnp.bfloat16)
    gamma2d = gamma.reshape(1, D).astype(jnp.float32)

    io_bytes = jnp.dtype(x.dtype).itemsize
    vmem_est = (
        4 * tn * D * io_bytes                    # double-buffered in + out tiles
        + 2 * (D * 2 * H + H * D) * 2            # bf16 weights (double-buffered)
        + 6 * tn * 2 * H * 4                     # f32 intermediates (proj/exps/h)
    )
    vmem_limit = min(64 * 1024 * 1024, max(32 * 1024 * 1024, (vmem_est * 3) // 2))

    kernel = functools.partial(_byte_mlp_kernel, eps=eps)

    # NOTE: if profiling on v5e (lowest HBM BW) shows exposed input DMA at
    # token_tile >= 512, add pipeline_mode=pl.Buffered(3) to the x BlockSpec only.
    out2d = pl.pallas_call(
        kernel,
        out_shape=jax.ShapeDtypeStruct((N, D), x.dtype),
        grid_spec=pltpu.PrefetchScalarGridSpec(
            num_scalar_prefetch=0,
            grid=(n_blocks,),
            in_specs=[
                pl.BlockSpec((tn, D), lambda i: (i, 0)),        # streamed token tile
                pl.BlockSpec((1, D), lambda i: (0, 0)),         # gamma (grid-invariant)
                pl.BlockSpec((D, 2 * H), lambda i: (0, 0)),     # w13   (grid-invariant)
                pl.BlockSpec((H, D), lambda i: (0, 0)),         # w2    (grid-invariant)
            ],
            out_specs=pl.BlockSpec((tn, D), lambda i: (i, 0)),
        ),
        compiler_params=pltpu.CompilerParams(
            dimension_semantics=("parallel",),
            vmem_limit_bytes=vmem_limit,
        ),
    )(x2d, gamma2d, w13, w2)

    return out2d.reshape(B, S, D)


def reference_byte_mlp(x, gamma, w13_t, w2_t, eps=1e-6):
    """Pure-JAX f32 reference mirroring the PyTorch forward (eval mode)."""
    H = w2_t.shape[0]
    residual = x
    ms = jnp.mean(x * x, axis=-1, keepdims=True)
    xn = x * jax.lax.rsqrt(ms + eps) * gamma
    proj = xn @ w13_t
    gate, value = proj[..., :H], proj[..., H:]
    h = (value * jax.nn.sigmoid(value)) * jax.nn.sigmoid(gate)
    return h @ w2_t + residual


if __name__ == "__main__":
    # Module config: dim=128, multiple_of=256 -> hidden_dim = 512
    dim = 128
    multiple_of = 256
    hidden_dim = int(8 * dim / 3)
    hidden_dim = multiple_of * ((hidden_dim + multiple_of - 1) // multiple_of)  # 512

    eps = 1e-6
    key = jax.random.PRNGKey(0)
    k_x, k_g, k_w13, k_w2, k_x2 = jax.random.split(key, 5)

    gamma = 1.0 + 0.1 * jax.random.normal(k_g, (dim,), dtype=jnp.float32)
    w13_t = jax.random.uniform(k_w13, (dim, 2 * hidden_dim),
                               minval=-1.0 / dim ** 0.5, maxval=1.0 / dim ** 0.5,
                               dtype=jnp.float32)
    w2_t = jax.random.uniform(k_w2, (hidden_dim, dim),
                              minval=-1.0 / hidden_dim ** 0.5,
                              maxval=1.0 / hidden_dim ** 0.5,
                              dtype=jnp.float32)

    # Case A: batch=2, seq=8 (N=16); default tile clamps to 16 -> single block,
    # zero padding / zero extra copies.
    x_a = jax.random.normal(k_x, (2, 8, dim), dtype=jnp.float32)
    ref_a = reference_byte_mlp(x_a, gamma, w13_t, w2_t, eps=eps)
    out_a = jax.block_until_ready(byte_mlp_pallas(x_a, gamma, w13_t, w2_t, eps=eps))

    # Case B: tiny tile -> 2-step pipelined grid; must match case A exactly.
    out_b = jax.block_until_ready(
        byte_mlp_pallas(x_a, gamma, w13_t, w2_t, eps=eps, token_tile=8))

    # Case C: N=24 with tile=16 -> non-divisible grid (partial, masked last block).
    x_c = jax.random.normal(k_x2, (3, 8, dim), dtype=jnp.float32)
    ref_c = reference_byte_mlp(x_c, gamma, w13_t, w2_t, eps=eps)
    out_c = jax.block_until_ready(
        byte_mlp_pallas(x_c, gamma, w13_t, w2_t, eps=eps, token_tile=16))

    # Case D: bf16 activation I/O (halves streamed bytes; residual stays f32 in-kernel).
    out_d = jax.block_until_ready(
        byte_mlp_pallas(x_a.astype(jnp.bfloat16), gamma, w13_t, w2_t, eps=eps))

    assert out_a.shape == (2, 8, dim)
    assert out_c.shape == (3, 8, dim)
    # bf16 MXU operands + approx reciprocal vs f32 reference -> loose tolerance.
    assert jnp.allclose(out_a, ref_a, atol=3e-2, rtol=3e-2), "case A mismatch"
    assert jnp.allclose(out_b, ref_a, atol=3e-2, rtol=3e-2), "case B mismatch"
    assert jnp.allclose(out_a, out_b, atol=1e-5, rtol=1e-5), "tile-size dependence"
    assert jnp.allclose(out_c, ref_c, atol=3e-2, rtol=3e-2), "case C (partial tile) mismatch"
    assert out_d.dtype == jnp.bfloat16
    assert jnp.allclose(out_d.astype(jnp.float32), ref_a, atol=1e-1, rtol=1e-1), \
        "case D (bf16 I/O) mismatch"

    print("KERNEL_OK")
</pallas_src>

<mosaic_0001>
module attributes {stable_mosaic.version = 11 : i64} {
  func.func @_byte_mlp_kernel(%arg0: i32, %arg1: memref<16x128xf32, #tpu.memory_space<vmem>>, %arg2: memref<1x128xf32, #tpu.memory_space<vmem>>, %arg3: memref<128x1024xbf16, #tpu.memory_space<vmem>>, %arg4: memref<512x128xbf16, #tpu.memory_space<vmem>>, %arg5: memref<16x128xf32, #tpu.memory_space<vmem>>) attributes {dimension_semantics = [#tpu.dimension_semantics<parallel>], iteration_bounds = array<i64: 1>, scalar_prefetch = 0 : i64, scratch_operands = 0 : i64, tpu.core_type = #tpu.core_type<tc>, window_params = [{transform_indices = @transform_0, window_bounds = array<i64: 16, 128>}, {pipeline_mode = #tpu.pipeline_mode<synchronous>, transform_indices = @transform_1, window_bounds = array<i64: 1, 128>}, {pipeline_mode = #tpu.pipeline_mode<synchronous>, transform_indices = @transform_2, window_bounds = array<i64: 128, 1024>}, {pipeline_mode = #tpu.pipeline_mode<synchronous>, transform_indices = @transform_3, window_bounds = array<i64: 512, 128>}, {transform_indices = @transform_4, window_bounds = array<i64: 16, 128>}]} {
    %c0 = arith.constant 0 : index
    %c0_0 = arith.constant 0 : index
    %0 = vector.load %arg1[%c0, %c0_0] : memref<16x128xf32, #tpu.memory_space<vmem>>, vector<16x128xf32>
    %1 = arith.mulf %0, %0 : vector<16x128xf32>
    %cst = arith.constant dense<0.000000e+00> : vector<16xf32>
    %2 = vector.multi_reduction <add>, %1, %cst [1] : vector<16x128xf32> to vector<16xf32>
    %3 = vector.shape_cast %2 : vector<16xf32> to vector<16x1xf32>
    %cst_1 = arith.constant 1.280000e+02 : f32
    %4 = vector.broadcast %cst_1 : f32 to vector<16x1xf32>
    %5 = arith.divf %3, %4 : vector<16x1xf32>
    %cst_2 = arith.constant 9.99999997E-7 : f32
    %6 = vector.broadcast %cst_2 : f32 to vector<16x1xf32>
    %7 = arith.addf %5, %6 : vector<16x1xf32>
    %8 = math.rsqrt %7 : vector<16x1xf32>
    %9 = vector.broadcast %8 : vector<16x1xf32> to vector<16x128xf32>
    %10 = arith.mulf %0, %9 : vector<16x128xf32>
    %c0_3 = arith.constant 0 : index
    %c0_4 = arith.constant 0 : index
    %11 = vector.load %arg2[%c0_3, %c0_4] : memref<1x128xf32, #tpu.memory_space<vmem>>, vector<1x128xf32>
    %12 = vector.broadcast %11 : vector<1x128xf32> to vector<16x128xf32>
    %13 = arith.mulf %10, %12 : vector<16x128xf32>
    %14 = arith.truncf %13 : vector<16x128xf32> to vector<16x128xbf16>
    %c0_5 = arith.constant 0 : index
    %c0_6 = arith.constant 0 : index
    %15 = vector.load %arg3[%c0_5, %c0_6] : memref<128x1024xbf16, #tpu.memory_space<vmem>>, vector<128x1024xbf16>
    %cst_7 = arith.constant dense<0.000000e+00> : vector<16x1024xf32>
    %16 = tpu.matmul %14, %15, %cst_7 {dimension_numbers = #tpu.dot_dimension_numbers<[1], [0], [0], [1], [0, 0, 1, 1], [], []>} : vector<16x128xbf16>, vector<128x1024xbf16>, vector<16x1024xf32> -> vector<16x1024xf32>
    %17 = vector.extract_strided_slice %16 {offsets = [0, 0], sizes = [16, 512], strides = [1, 1]} : vector<16x1024xf32> to vector<16x512xf32>
    %18 = vector.extract_strided_slice %16 {offsets = [0, 512], sizes = [16, 512], strides = [1, 1]} : vector<16x1024xf32> to vector<16x512xf32>
    %cst_8 = arith.constant 0.000000e+00 : f32
    %19 = vector.broadcast %cst_8 : f32 to vector<16x512xf32>
    %20 = arith.subf %19, %18 : vector<16x512xf32>
    %21 = math.exp %20 : vector<16x512xf32>
    %cst_9 = arith.constant 1.000000e+00 : f32
    %22 = vector.broadcast %cst_9 : f32 to vector<16x512xf32>
    %23 = arith.addf %22, %21 : vector<16x512xf32>
    %cst_10 = arith.constant 0.000000e+00 : f32
    %24 = vector.broadcast %cst_10 : f32 to vector<16x512xf32>
    %25 = arith.subf %24, %17 : vector<16x512xf32>
    %26 = math.exp %25 : vector<16x512xf32>
    %cst_11 = arith.constant 1.000000e+00 : f32
    %27 = vector.broadcast %cst_11 : f32 to vector<16x512xf32>
    %28 = arith.addf %27, %26 : vector<16x512xf32>
    %29 = arith.mulf %23, %28 : vector<16x512xf32>
    %30 = tpu.reciprocal %29 {approx = true} : vector<16x512xf32> -> vector<16x512xf32>
    %31 = arith.mulf %18, %30 : vector<16x512xf32>
    %32 = arith.truncf %31 : vector<16x512xf32> to vector<16x512xbf16>
    %c0_12 = arith.constant 0 : index
    %c0_13 = arith.constant 0 : index
    %33 = vector.load %arg4[%c0_12, %c0_13] : memref<512x128xbf16, #tpu.memory_space<vmem>>, vector<512x128xbf16>
    %cst_14 = arith.constant dense<0.000000e+00> : vector<16x128xf32>
    %34 = tpu.matmul %32, %33, %cst_14 {dimension_numbers = #tpu.dot_dimension_numbers<[1], [0], [0], [1], [0, 0, 1, 1], [], []>} : vector<16x512xbf16>, vector<512x128xbf16>, vector<16x128xf32> -> vector<16x128xf32>
    %35 = arith.addf %34, %0 : vector<16x128xf32>
    %c0_15 = arith.constant 0 : index
    %c0_16 = arith.constant 0 : index
    %36 = vector.load %arg5[%c0_15, %c0_16] : memref<16x128xf32, #tpu.memory_space<vmem>>, vector<16x128xf32>
    tpu.vector_store %arg5[%c0_15, %c0_16], %35 {strides = array<i32>} : memref<16x128xf32, #tpu.memory_space<vmem>>, vector<16x128xf32>,
    return
  }
  func.func @transform_0(%arg0: i32) -> (i32, i32) {
    %c0_i32 = arith.constant 0 : i32
    %c0_i32_0 = arith.constant 0 : i32
    return %arg0, %c0_i32 : i32, i32
  }
  func.func @transform_1(%arg0: i32) -> (i32, i32) {
    %c0_i32 = arith.constant 0 : i32
    %c0_i32_0 = arith.constant 0 : i32
    %c0_i32_1 = arith.constant 0 : i32
    return %c0_i32, %c0_i32_0 : i32, i32
  }
  func.func @transform_2(%arg0: i32) -> (i32, i32) {
    %c0_i32 = arith.constant 0 : i32
    %c0_i32_0 = arith.constant 0 : i32
    %c0_i32_1 = arith.constant 0 : i32
    return %c0_i32, %c0_i32_0 : i32, i32
  }
  func.func @transform_3(%arg0: i32) -> (i32, i32) {
    %c0_i32 = arith.constant 0 : i32
    %c0_i32_0 = arith.constant 0 : i32
    %c0_i32_1 = arith.constant 0 : i32
    return %c0_i32, %c0_i32_0 : i32, i32
  }
  func.func @transform_4(%arg0: i32) -> (i32, i32) {
    %c0_i32 = arith.constant 0 : i32
    %c0_i32_0 = arith.constant 0 : i32
    return %arg0, %c0_i32 : i32, i32
  }
}

</mosaic_0001>

<bundles_post_ra>
// kernel: byte_mlp_pallas.1
= control target key start
LH: loop header
LB: loop body
LE: loop exit
PB: predicated region body
PF: predicated region fallthrough
CT: control target
= control target key end

     0   :  { %v1301_v44 = vmov 0   ;;  %s1684_s0 = inlined_call_operand.vmem [shape: f32[16,128], index: 0, kind: input, shape index: {}]   ;;  %s1685_s1 = inlined_call_operand.vmem [shape: f32[1,128], index: 1, kind: input, shape index: {}]   ;;  %s1686_s2 = inlined_call_operand.vmem [shape: bf16[128,1024], index: 2, kind: input, shape index: {}]   ;;  %s1687_s3 = inlined_call_operand.vmem [shape: bf16[512,128], index: 3, kind: input, shape index: {}]   ;;  %s1688_s4 = inlined_call_operand.hbm [shape: f32[16,128], index: 4, kind: output, shape index: {}]  }
   0x1   :  { %v1333_v0 = vld [vmem:[%s1684_s0] sm:$0xff]  ;;  %v1338_v1 = vld [vmem:[%s1684_s0 + $0x8] sm:$0xff]  ;;  %462 = vmatprep.mubr.bf16.mxu0 %v1301_v44  ;;  %505 = vmatprep.mubr.bf16.mxu1 %v1301_v44  ;;  %v104_v62 = vld [vmem:[%s1686_s2 + $0x1d0] sm:$0xff] }
   0x2   :  { %v102_v2 = vld [vmem:[%s1686_s2 + $0x1c0] sm:$0xff]  ;;  %v21_v3 = vmul.f32 %v1333_v0, %v1333_v0  ;;  %v103_v5 = vld [vmem:[%s1686_s2 + $0x1c8] sm:$0xff]  ;;  %v22_v14 = vmul.f32 %v1338_v1, %v1338_v1  ;;  %v108_v63 = vld [vmem:[%s1686_s2 + $0x1f0] sm:$0xff] }
   0x3   :  { %v106_v4 = vld [vmem:[%s1686_s2 + $0x1e0] sm:$0xff]  ;;  %v107_v6 = vld [vmem:[%s1686_s2 + $0x1e8] sm:$0xff] }
   0x4   :  { %v1108_v7 = vcombine.high %v102_v2, %v106_v4  ;;  %v1110_v8 = vcombine.high %v103_v5, %v107_v6  ;;  %v1107_v9 = vcombine.low %v102_v2, %v106_v4  ;;  %v1109_v10 = vcombine.low %v103_v5, %v107_v6  ;;  %v94_v11 = vld [vmem:[%s1686_s2 + $0x180] sm:$0xff]  ;;  %v95_v13 = vld [vmem:[%s1686_s2 + $0x188] sm:$0xff]  ;;  %23 = vadd.xlane.f32.xlu0 %v21_v3  ;;  %v105_v4 = vld [vmem:[%s1686_s2 + $0x1d8] sm:$0xff] }
   0x5   :  { %v98_v12 = vld [vmem:[%s1686_s2 + $0x1a0] sm:$0xff]  ;;  %v99_v16 = vld [vmem:[%s1686_s2 + $0x1a8] sm:$0xff]  ;;  %v1111_v3 = vcombine.low %v104_v62, %v108_v63  ;;  %v109_v5 = vld [vmem:[%s1686_s2 + $0x1f8] sm:$0xff] }
   0x6   :  { %v1100_v15 = vcombine.high %v94_v11, %v98_v12  ;;  %430 = vmatprep.subr.bf16.mxu0 %v1108_v7  ;;  %473 = vmatprep.subr.bf16.mxu1 %v1110_v8  ;;  %v1102_v17 = vcombine.high %v95_v13, %v99_v16  ;;  %v1099_v18 = vcombine.low %v94_v11, %v98_v12  ;;  %v86_v20 = vld [vmem:[%s1686_s2 + $0x140] sm:$0xff]  ;;  %v87_v22 = vld [vmem:[%s1686_s2 + $0x148] sm:$0xff] }
   0x7   :  { %431 = vmatpush1.bf16.msra.mxu0 %v1107_v9  ;;  %474 = vmatpush1.bf16.msra.mxu1 %v1109_v10  ;;  %v1101_v19 = vcombine.low %v95_v13, %v99_v16  ;;  %v90_v21 = vld [vmem:[%s1686_s2 + $0x160] sm:$0xff]  ;;  %v91_v24 = vld [vmem:[%s1686_s2 + $0x168] sm:$0xff]  ;;  %v1113_v6 = vcombine.low %v105_v4, %v109_v5  ;;  %v1112_v13 = vcombine.high %v104_v62, %v108_v63 }
   0x8   :  { %432 = vmatprep.subr.bf16.mxu0 %v1100_v15  ;;  %475 = vmatprep.subr.bf16.mxu1 %v1102_v17  ;;  %v1092_v23 = vcombine.high %v86_v20, %v90_v21  ;;  %v1094_v25 = vcombine.high %v87_v22, %v91_v24  ;;  %v1091_v26 = vcombine.low %v86_v20, %v90_v21  ;;  %v78_v28 = vld [vmem:[%s1686_s2 + $0x100] sm:$0xff]  ;;  %v79_v30 = vld [vmem:[%s1686_s2 + $0x108] sm:$0xff] }
   0x9   :  { %25 = vadd.xlane.f32.xlu0 %v22_v14  ;;  %v1093_v27 = vcombine.low %v87_v22, %v91_v24  ;;  %v82_v29 = vld [vmem:[%s1686_s2 + $0x120] sm:$0xff]  ;;  %v83_v32 = vld [vmem:[%s1686_s2 + $0x128] sm:$0xff] }
   0xa   :  { %v1084_v31 = vcombine.high %v78_v28, %v82_v29  ;;  %v1086_v33 = vcombine.high %v79_v30, %v83_v32  ;;  %v1083_v34 = vcombine.low %v78_v28, %v82_v29  ;;  %v1085_v35 = vcombine.low %v79_v30, %v83_v32  ;;  %v70_v36 = vld [vmem:[%s1686_s2 + $0xc0] sm:$0xff]  ;;  %v71_v38 = vld [vmem:[%s1686_s2 + $0xc8] sm:$0xff] }
   0xb   :  { %433 = vmatpush1.bf16.msra.mxu0 %v1099_v18  ;;  %476 = vmatpush1.bf16.msra.mxu1 %v1101_v19  ;;  %v74_v37 = vld [vmem:[%s1686_s2 + $0xe0] sm:$0xff]  ;;  %v75_v40 = vld [vmem:[%s1686_s2 + $0xe8] sm:$0xff] }
   0xc   :  { %434 = vmatprep.subr.bf16.mxu0 %v1092_v23  ;;  %477 = vmatprep.subr.bf16.mxu1 %v1094_v25  ;;  %v1076_v39 = vcombine.high %v70_v36, %v74_v37  ;;  %v1075_v41 = vcombine.low %v70_v36, %v74_v37  ;;  %v62_v42 = vld [vmem:[%s1686_s2 + $0x80] sm:$0xff]  ;;  %v1078_v45 = vcombine.high %v71_v38, %v75_v40  ;;  %v63_v48 = vld [vmem:[%s1686_s2 + $0x88] sm:$0xff] }
   0xd   :  { %v66_v43 = vld [vmem:[%s1686_s2 + $0xa0] sm:$0xff]  ;;  %v1077_v46 = vcombine.low %v71_v38, %v75_v40  ;;  %v67_v49 = vld [vmem:[%s1686_s2 + $0xa8] sm:$0xff] }
   0xe   :  { %v1068_v47 = vcombine.high %v62_v42, %v66_v43  ;;  %v54_v50 = vld [vmem:[%s1686_s2 + $0x40] sm:$0xff]  ;;  %v1070_v51 = vcombine.high %v63_v48, %v67_v49  ;;  %v55_v53 = vld [vmem:[%s1686_s2 + $0x48] sm:$0xff]  ;;  %v1067_v55 = vcombine.low %v62_v42, %v66_v43  ;;  %v1069_v58 = vcombine.low %v63_v48, %v67_v49 }
   0xf   :  { %435 = vmatpush1.bf16.msra.mxu0 %v1091_v26  ;;  %478 = vmatpush1.bf16.msra.mxu1 %v1093_v27  ;;  %v58_v52 = vld [vmem:[%s1686_s2 + $0x60] sm:$0xff]  ;;  %v59_v54 = vld [vmem:[%s1686_s2 + $0x68] sm:$0xff] }
  0x10   :  { %436 = vmatprep.subr.bf16.mxu0 %v1084_v31  ;;  %479 = vmatprep.subr.bf16.mxu1 %v1086_v33  ;;  %v46_v56 = vld [vmem:[%s1686_s2] sm:$0xff]  ;;  %v1060_v59 = vcombine.high %v54_v50, %v58_v52  ;;  %v47_v60 = vld [vmem:[%s1686_s2 + $0x8] sm:$0xff]  ;;  %v1062_v2 = vcombine.high %v55_v53, %v59_v54  ;;  %v1059_v7 = vcombine.low %v54_v50, %v58_v52 }
  0x11   :  { %v50_v57 = vld [vmem:[%s1686_s2 + $0x20] sm:$0xff]  ;;  %v51_v61 = vld [vmem:[%s1686_s2 + $0x28] sm:$0xff]  ;;  %v1061_v8 = vcombine.low %v55_v53, %v59_v54 }
  0x12   :  { %v1052_v9 = vcombine.high %v46_v56, %v50_v57  ;;  %v1054_v10 = vcombine.high %v47_v60, %v51_v61  ;;  %v1051_v11 = vcombine.low %v46_v56, %v50_v57  ;;  %v1053_v12 = vcombine.low %v47_v60, %v51_v61 }
  0x13   :  { %437 = vmatpush1.bf16.msra.mxu0 %v1083_v34  ;;  %480 = vmatpush1.bf16.msra.mxu1 %v1085_v35 }
  0x14   :  { %438 = vmatprep.subr.bf16.mxu0 %v1076_v39  ;;  %481 = vmatprep.subr.bf16.mxu1 %v1078_v45 }
  0x17   :  { %439 = vmatpush1.bf16.msra.mxu0 %v1075_v41  ;;  %482 = vmatpush1.bf16.msra.mxu1 %v1077_v46 }
  0x18   :  { %440 = vmatprep.subr.bf16.mxu0 %v1068_v47  ;;  %483 = vmatprep.subr.bf16.mxu1 %v1070_v51 }
  0x1b   :  { %441 = vmatpush1.bf16.msra.mxu0 %v1067_v55  ;;  %484 = vmatpush1.bf16.msra.mxu1 %v1069_v58 }
  0x1c   :  { %442 = vmatprep.subr.bf16.mxu0 %v1060_v59  ;;  %485 = vmatprep.subr.bf16.mxu1 %v1062_v2 }
  0x1f   :  { %443 = vmatpush1.bf16.msra.mxu0 %v1059_v7  ;;  %486 = vmatpush1.bf16.msra.mxu1 %v1061_v8 }
  0x20   :  { %444 = vmatprep.subr.bf16.mxu0 %v1052_v9 }
  0x21   :  { %9 = vsyncpa [#allocation3], 0  ;;  %487 = vmatprep.subr.bf16.mxu1 %v1054_v10  ;;  %v1114_v14 = vcombine.high %v105_v4, %v109_v5  ;;  %v1050_v24 = vld [vmem:[%s1685_s1] ss:$0 sm:$0xff]  ;;  %v96_v26 = vld [vmem:[%s1686_s2 + $0x190] sm:$0xff] }
  0x22   :  { %v100_v27 = vld [vmem:[%s1686_s2 + $0x1b0] sm:$0xff]  ;;  %v97_v28 = vld [vmem:[%s1686_s2 + $0x198] sm:$0xff] }
  0x23   :  { %445 = vmatpush1.bf16.msra.mxu0 %v1051_v11  ;;  %488 = vmatpush1.bf16.msra.mxu1 %v1053_v12  ;;  %v101_v29 = vld [vmem:[%s1686_s2 + $0x1b8] sm:$0xff]  ;;  %v1104_v33 = vcombine.high %v96_v26, %v100_v27  ;;  %v88_v35 = vld [vmem:[%s1686_s2 + $0x150] sm:$0xff]  ;;  %v1103_v39 = vcombine.low %v96_v26, %v100_v27 }
  0x24   :  { %516 = vmatprep.subr.bf16.mxu0 %v1112_v13  ;;  %559 = vmatprep.subr.bf16.mxu1 %v1114_v14  ;;  %v1106_v34 = vcombine.high %v97_v28, %v101_v29  ;;  %v92_v36 = vld [vmem:[%s1686_s2 + $0x170] sm:$0xff]  ;;  %v89_v37 = vld [vmem:[%s1686_s2 + $0x158] sm:$0xff]  ;;  %v1105_v40 = vcombine.low %v97_v28, %v101_v29 }
  0x25   :  { %v93_v38 = vld [vmem:[%s1686_s2 + $0x178] sm:$0xff]  ;;  %v1096_v41 = vcombine.high %v88_v35, %v92_v36  ;;  %v80_v43 = vld [vmem:[%s1686_s2 + $0x110] sm:$0xff]  ;;  %v1095_v48 = vcombine.low %v88_v35, %v92_v36  ;;  %v1207_v35 = vld [vmem:[%s1687_s3 + $0x60] sm:$0xff]  }
  0x26   :  { %v1098_v42 = vcombine.high %v89_v37, %v93_v38  ;;  %v84_v45 = vld [vmem:[%s1686_s2 + $0x130] sm:$0xff]  ;;  %v81_v46 = vld [vmem:[%s1686_s2 + $0x118] sm:$0xff]  ;;  %v1097_v49 = vcombine.low %v89_v37, %v93_v38  ;;  %v1208_v36 = vld [vmem:[%s1687_s3 + $0xe0] sm:$0xff]  }
  0x27   :  { %v85_v47 = vld [vmem:[%s1686_s2 + $0x138] sm:$0xff]  ;;  %v1088_v50 = vcombine.high %v80_v43, %v84_v45  ;;  %v72_v52 = vld [vmem:[%s1686_s2 + $0xd0] sm:$0xff]  ;;  %v1087_v55 = vcombine.low %v80_v43, %v84_v45  ;;  %v1209_v37 = vld [vmem:[%s1687_s3 + $0x20] sm:$0xff]  }
  0x28   :  { %v1090_v51 = vcombine.high %v81_v46, %v85_v47  ;;  %v76_v53 = vld [vmem:[%s1686_s2 + $0xf0] sm:$0xff]  ;;  %v77_v54 = vld [vmem:[%s1686_s2 + $0xf8] sm:$0xff]  ;;  %v1089_v56 = vcombine.low %v81_v46, %v85_v47  ;;  %v1210_v38 = vld [vmem:[%s1687_s3 + $0xa0] sm:$0xff]  }
  0x29   :  { %v1080_v57 = vcombine.high %v72_v52, %v76_v53  ;;  %v64_v59 = vld [vmem:[%s1686_s2 + $0x90] sm:$0xff]  ;;  %v65_v61 = vld [vmem:[%s1686_s2 + $0x98] sm:$0xff]  ;;  %v1079_v63 = vcombine.low %v72_v52, %v76_v53  ;;  %v1223_v52 = vld [vmem:[%s1687_s3 + $0x40] sm:$0xff]  }
  0x2a   :  { %v68_v60 = vld [vmem:[%s1686_s2 + $0xb0] sm:$0xff]  ;;  %v69_v62 = vld [vmem:[%s1686_s2 + $0xb8] sm:$0xff]  ;;  %v1224_v53 = vld [vmem:[%s1687_s3 + $0xc0] sm:$0xff]  }
  0x2b   :  { %v1074_v4 = vcombine.high %v65_v61, %v69_v62  ;;  %v56_v5 = vld [vmem:[%s1686_s2 + $0x50] sm:$0xff]  ;;  %v57_v7 = vld [vmem:[%s1686_s2 + $0x58] sm:$0xff]  ;;  %v1071_v9 = vcombine.low %v64_v59, %v68_v60  ;;  %v1073_v10 = vcombine.low %v65_v61, %v69_v62 }
  0x2c   :  { %v61_v8 = vld [vmem:[%s1686_s2 + $0x78] sm:$0xff]  ;;  %v48_v13 = vld [vmem:[%s1686_s2 + $0x10] sm:$0xff] }
  0x2d   :  { %v1066_v12 = vcombine.high %v57_v7, %v61_v8  ;;  %v52_v14 = vld [vmem:[%s1686_s2 + $0x30] sm:$0xff]  ;;  %v1198_v26 = vld [vmem:[%s1687_s3 + $0xb8] sm:$0xff]  }
  0x2e   :  { %v1199_v27 = vld [vmem:[%s1687_s3 + $0x70] sm:$0xff]  }
  0x2f   :  { %v1200_v28 = vld [vmem:[%s1687_s3 + $0xf0] sm:$0xff]  }
  0x30   :  { %v1201_v29 = vld [vmem:[%s1687_s3 + $0x30] sm:$0xff]  }
  0x31   :  { %v1215_v43 = vld [vmem:[%s1687_s3 + $0x50] sm:$0xff]  }
  0x32   :  { %v1216_v45 = vld [vmem:[%s1687_s3 + $0xd0] sm:$0xff]  }
  0x33   :  { %v1217_v46 = vld [vmem:[%s1687_s3 + $0x10] sm:$0xff]  }
  0x34   :  { %v1218_v47 = vld [vmem:[%s1687_s3 + $0x90] sm:$0xff]  }
  0x8d   :  { %v24_v15 = vpop.xlane.xlu0 %23 }
  0x8e   :  { %v28_v16 = vmul.f32 0.0078125, %v24_v15  ;;  %v49_v15 = vld [vmem:[%s1686_s2 + $0x18] sm:$0xff] }
  0x90   :  { %v30_v17 = vadd.f32 1e-06, %v28_v16  ;;  %v53_v16 = vld [vmem:[%s1686_s2 + $0x38] sm:$0xff] }
  0x92   :  { %v26_v18 = vpop.xlane.xlu0 %25  ;;  %1227 = vrsqrt.f32 %v30_v17 }
  0x93   :  { %v29_v19 = vmul.f32 0.0078125, %v26_v18  ;;  %v1065_v18 = vcombine.low %v57_v7, %v61_v8 }
  0x95   :  { %v31_v20 = vadd.f32 1e-06, %v29_v19  ;;  %v1056_v19 = vcombine.high %v48_v13, %v52_v14 }
  0x97   :  { %1229 = vrsqrt.f32 %v31_v20  ;;  %v1058_v20 = vcombine.high %v49_v15, %v53_v16 }
  0x9f   :  { %v1228_v21 = vpop.eup %1227 }
  0xa0   :  { %v34_v22 = vmul.f32 %v1228_v21, %v1333_v0  ;;  %v1055_v21 = vcombine.low %v48_v13, %v52_v14 }
  0xa2   :  { %v43_v30 = vmul.f32 %v1050_v24, %v34_v22  ;;  %v1057_v22 = vcombine.low %v49_v15, %v53_v16 }
  0xa4   :  { %v1230_v23 = vpop.eup %1229 }
  0xa5   :  { %v35_v25 = vmul.f32 %v1230_v23, %v1338_v1  ;;  %v1195_v23 = vld [vmem:[%s1687_s3 + $0x78] sm:$0xff]  }
  0xa7   :  { %v44_v31 = vmul.f32 %v1050_v24, %v35_v25  ;;  %v1196_v24 = vld [vmem:[%s1687_s3 + $0xf8] sm:$0xff]  }
  0xa8   :  { %v1197_v25 = vld [vmem:[%s1687_s3 + $0x38] sm:$0xff]  }
  0xa9   :  { %v1471_v32 = vpack.c.bf16 %v44_v31, %v43_v30  ;;  %v1202_v30 = vld [vmem:[%s1687_s3 + $0xb0] sm:$0xff]   ;;  %v1203_v31 = vld [vmem:[%s1687_s3 + $0x68] sm:$0xff]  }
  0xab   :  { %463 = vmatmul.mubr.bf16.vlgmr.msra.gmra.mxu0 %v1471_v32  ;;  %506 = vmatmul.mubr.bf16.vlgmr.msra.gmra.mxu1 %v1471_v32 }
  0xac   :  { %517 = vmatpush1.bf16.msra.mxu0 %v1111_v3  ;;  %560 = vmatpush1.bf16.msra.mxu1 %v1113_v6  ;;  %v1072_v3 = vcombine.high %v64_v59, %v68_v60  ;;  %v60_v6 = vld [vmem:[%s1686_s2 + $0x70] sm:$0xff] }
  0xad   :  { %518 = vmatprep.subr.bf16.mxu0 %v1104_v33  ;;  %561 = vmatprep.subr.bf16.mxu1 %v1106_v34  ;;  %v1064_v11 = vcombine.high %v56_v5, %v60_v6  ;;  %v1063_v17 = vcombine.low %v56_v5, %v60_v6  ;;  %v1205_v33 = vld [vmem:[%s1687_s3 + $0x28] sm:$0xff]  }
  0xae   :  { %548 = vmatprep.mubr.bf16.mxu0 %v1301_v44  ;;  %591 = vmatprep.mubr.bf16.mxu1 %v1301_v44  ;;  %v73_v44 = vld [vmem:[%s1686_s2 + $0xd8] sm:$0xff]  ;;  %v1206_v34 = vld [vmem:[%s1687_s3 + $0xa8] sm:$0xff]  }
  0xaf   :  { %v1082_v58 = vcombine.high %v73_v44, %v77_v54  ;;  %v1081_v2 = vcombine.low %v73_v44, %v77_v54  ;;  %v1225_v44 = vld [vmem:[%s1687_s3] sm:$0xff]  }
  0xb0   :  { %519 = vmatpush1.bf16.msra.mxu0 %v1103_v39  ;;  %562 = vmatpush1.bf16.msra.mxu1 %v1105_v40  ;;  %v1211_v39 = vld [vmem:[%s1687_s3 + $0x58] sm:$0xff]   ;;  %v1226_v54 = vld [vmem:[%s1687_s3 + $0x80] sm:$0xff]  }
  0xb1   :  { %520 = vmatprep.subr.bf16.mxu0 %v1096_v41  ;;  %563 = vmatprep.subr.bf16.mxu1 %v1098_v42  ;;  %v1212_v40 = vld [vmem:[%s1687_s3 + $0xd8] sm:$0xff]  }
  0xb2   :  { %v1213_v41 = vld [vmem:[%s1687_s3 + $0x18] sm:$0xff]  }
  0xb3   :  { %v1214_v42 = vld [vmem:[%s1687_s3 + $0x98] sm:$0xff]  }
  0xb4   :  { %521 = vmatpush1.bf16.msra.mxu0 %v1095_v48  ;;  %564 = vmatpush1.bf16.msra.mxu1 %v1097_v49  ;;  %v1219_v48 = vld [vmem:[%s1687_s3 + $0x48] sm:$0xff]  }
  0xb5   :  { %522 = vmatprep.subr.bf16.mxu0 %v1088_v50  ;;  %565 = vmatprep.subr.bf16.mxu1 %v1090_v51  ;;  %v1220_v49 = vld [vmem:[%s1687_s3 + $0xc8] sm:$0xff]  }
  0xb6   :  { %v1221_v50 = vld [vmem:[%s1687_s3 + $0x8] sm:$0xff]  }
  0xb7   :  { %v1222_v51 = vld [vmem:[%s1687_s3 + $0x88] sm:$0xff]  }
  0xb8   :  { %523 = vmatpush1.bf16.msra.mxu0 %v1087_v55  ;;  %566 = vmatpush1.bf16.msra.mxu1 %v1089_v56 }
  0xb9   :  { %524 = vmatprep.subr.bf16.mxu0 %v1080_v57  ;;  %567 = vmatprep.subr.bf16.mxu1 %v1082_v58 }
  0xbc   :  { %525 = vmatpush1.bf16.msra.mxu0 %v1079_v63  ;;  %568 = vmatpush1.bf16.msra.mxu1 %v1081_v2 }
  0xbd   :  { %526 = vmatprep.subr.bf16.mxu0 %v1072_v3  ;;  %569 = vmatprep.subr.bf16.mxu1 %v1074_v4 }
  0xc0   :  { %527 = vmatpush1.bf16.msra.mxu0 %v1071_v9  ;;  %570 = vmatpush1.bf16.msra.mxu1 %v1073_v10 }
  0xc1   :  { %528 = vmatprep.subr.bf16.mxu0 %v1064_v11  ;;  %571 = vmatprep.subr.bf16.mxu1 %v1066_v12 }
  0xc4   :  { %529 = vmatpush1.bf16.msra.mxu0 %v1063_v17  ;;  %572 = vmatpush1.bf16.msra.mxu1 %v1065_v18 }
  0xc5   :  { %530 = vmatprep.subr.bf16.mxu0 %v1056_v19  ;;  %573 = vmatprep.subr.bf16.mxu1 %v1058_v20 }
  0xc8   :  { %531 = vmatpush1.bf16.msra.mxu0 %v1055_v21  ;;  %574 = vmatpush1.bf16.msra.mxu1 %v1057_v22 }
  0xc9   :  { %1147 = vmatprep.subr.bf16.mxu0 %v1195_v23  ;;  %1169 = vmatprep.subr.bf16.mxu1 %v1196_v24 }
  0xcb   :  { %549 = vmatmul.mubr.bf16.vlgmr.msra.gmra.mxu0 %v1471_v32  ;;  %592 = vmatmul.mubr.bf16.vlgmr.msra.gmra.mxu1 %v1471_v32  ;;  %v1204_v32 = vld [vmem:[%s1687_s3 + $0xe8] sm:$0xff]   ;;  %s1302_s3 = smov [#allocation2]  }
  0xcc   :  { %1148 = vmatpush3.bf16.msra.mxu0 %v1197_v25  ;;  %1170 = vmatpush3.bf16.msra.mxu1 %v1198_v26  ;;  %s1039_s17 = sshll.u32 %s1302_s3, 4  ;;  %s1040_s17 = int_to_ptr.vmem [resolvable:$true] %s1039_s17 }
  0xcd   :  { %1149 = vmatprep.subr.bf16.mxu0 %v1199_v27  ;;  %1171 = vmatprep.subr.bf16.mxu1 %v1200_v28  ;;  %s1279_s18 = scalar_lea.vmem %s1040_s17, 256  ;;  %p1284_p1 = scmp.lt.s32.totalorder %s1040_s17, %s1040_s17 }
  0xce   :  { %p1280_p0 = scmp.ne.s32.totalorder %s1040_s17, %s1279_s18  ;;  %p1285_p2 = scmp.lt.s32.totalorder %s1279_s18, %s1279_s18 }
  0xd0   :  { %1150 = vmatpush3.bf16.msra.mxu0 %v1201_v29  ;;  %1172 = vmatpush3.bf16.msra.mxu1 %v1202_v30  ;;  %p1286_p3 = por %p1285_p2, %p1284_p1 }
  0xd1   :  { %1151 = vmatprep.subr.bf16.mxu0 %v1203_v31  ;;  %1173 = vmatprep.subr.bf16.mxu1 %v1204_v32 }
  0xd2   :  { %p1287_p4 = pnand %p1286_p3, %p1280_p0 }
  0xd4   :  { %1152 = vmatpush3.bf16.msra.mxu0 %v1205_v33  ;;  %1174 = vmatpush3.bf16.msra.mxu1 %v1206_v34 }
  0xd5   :  { %1153 = vmatprep.subr.bf16.mxu0 %v1207_v35  ;;  %1175 = vmatprep.subr.bf16.mxu1 %v1208_v36 }
  0xd8   :  { %1154 = vmatpush3.bf16.msra.mxu0 %v1209_v37  ;;  %1176 = vmatpush3.bf16.msra.mxu1 %v1210_v38 }
  0xd9   :  { %1155 = vmatprep.subr.bf16.mxu0 %v1211_v39  ;;  %1177 = vmatprep.subr.bf16.mxu1 %v1212_v40 }
  0xdc   :  { %1156 = vmatpush3.bf16.msra.mxu0 %v1213_v41  ;;  %1178 = vmatpush3.bf16.msra.mxu1 %v1214_v42 }
  0xdd   :  { %1157 = vmatprep.subr.bf16.mxu0 %v1215_v43  ;;  %1179 = vmatprep.subr.bf16.mxu1 %v1216_v45 }
  0xe0   :  { %1158 = vmatpush3.bf16.msra.mxu0 %v1217_v46  ;;  %1180 = vmatpush3.bf16.msra.mxu1 %v1218_v47 }
  0xe1   :  { %1159 = vmatprep.subr.bf16.mxu0 %v1219_v48  ;;  %1181 = vmatprep.subr.bf16.mxu1 %v1220_v49 }
  0xe4   :  { %1160 = vmatpush3.bf16.msra.mxu0 %v1221_v50  ;;  %1182 = vmatpush3.bf16.msra.mxu1 %v1222_v51 }
  0xe5   :  { %1161 = vmatprep.subr.bf16.mxu0 %v1223_v52  ;;  %1183 = vmatprep.subr.bf16.mxu1 %v1224_v53 }
  0xe8   :  { %1162 = vmatpush3.bf16.msra.mxu0 %v1225_v44  ;;  %1184 = vmatpush3.bf16.msra.mxu1 %v1226_v54 }
 0x16b   :  { %v464_v55 = vpop.f32.mrf.mxu0  ;;  %v507_v56 = vpop.f32.mrf.mxu1 }
 0x16c   :  { %v634_v60 = vsub.f32 0.0, %v464_v55  ;;  %v636_v61 = vsub.f32 0.0, %v507_v56 }
 0x16d   :  { %v466_v57 = vpop.f32.mrf.mxu0  ;;  %v509_v58 = vpop.f32.mrf.mxu1 }
 0x16e   :  { %v635_v63 = vsub.f32 0.0, %v466_v57  ;;  %v637_v2 = vsub.f32 0.0, %v509_v58  ;;  %v642_v4 = vmul.f32 1.442695, %v634_v60  ;;  %v646_v6 = vmul.f32 1.442695, %v636_v61 }
 0x16f   :  { %v468_v59 = vpop.f32.mrf.mxu0  ;;  %v511_v62 = vpop.f32.mrf.mxu1 }
 0x170   :  { %v638_v5 = vsub.f32 0.0, %v468_v59  ;;  %v640_v7 = vsub.f32 0.0, %v511_v62  ;;  %v644_v9 = vmul.f32 1.442695, %v635_v63  ;;  %v648_v11 = vmul.f32 1.442695, %v637_v2 }
 0x171   :  { %v470_v3 = vpop.f32.mrf.mxu0  ;;  %v513_v8 = vpop.f32.mrf.mxu1  ;;  %1231 = vpow2.f32 %v642_v4 }
 0x172   :  { %v639_v10 = vsub.f32 0.0, %v470_v3  ;;  %v650_v12 = vmul.f32 1.442695, %v638_v5  ;;  %v641_v13 = vsub.f32 0.0, %v513_v8  ;;  %1233 = vpow2.f32 %v646_v6 }
 0x173   :  { %v654_v14 = vmul.f32 1.442695, %v640_v7  ;;  %1235 = vpow2.f32 %v644_v9 }
 0x174   :  { %v652_v15 = vmul.f32 1.442695, %v639_v10  ;;  %1237 = vpow2.f32 %v648_v11  ;;  %v656_v16 = vmul.f32 1.442695, %v641_v13 }
 0x175   :  { %1239 = vpow2.f32 %v650_v12 }
 0x176   :  { %1241 = vpow2.f32 %v654_v14 }
 0x177   :  { %1243 = vpow2.f32 %v652_v15 }
 0x178   :  { %1245 = vpow2.f32 %v656_v16 }
 0x17e   :  { %v1232_v39 = vpop.eup %1231 }
 0x17f   :  { %v1234_v42 = vpop.eup %1233  ;;  %v658_v52 = vadd.f32 1.0, %v1232_v39 }
 0x180   :  { %v1236_v43 = vpop.eup %1235  ;;  %v660_v54 = vadd.f32 1.0, %v1234_v42 }
 0x181   :  { %v1238_v45 = vpop.eup %1237  ;;  %v659_v57 = vadd.f32 1.0, %v1236_v43 }
 0x182   :  { %v1240_v46 = vpop.eup %1239  ;;  %v661_v61 = vadd.f32 1.0, %v1238_v45 }
 0x183   :  { %v1242_v47 = vpop.eup %1241  ;;  %v662_v3 = vadd.f32 1.0, %v1240_v46 }
 0x184   :  { %v1244_v48 = vpop.eup %1243  ;;  %v664_v7 = vadd.f32 1.0, %v1242_v47 }
 0x185   :  { %v1246_v49 = vpop.eup %1245  ;;  %v663_v11 = vadd.f32 1.0, %v1244_v48 }
 0x186   :  { %v665_v14 = vadd.f32 1.0, %v1246_v49 }
 0x18b   :  { %v1647_v17 = vpop.f32.mrf.mxu0  ;;  %v1649_v18 = vpop.f32.mrf.mxu1 }
 0x18c   :  { %v602_v19 = vsub.f32 0.0, %v1647_v17  ;;  %v604_v20 = vsub.f32 0.0, %v1649_v18 }
 0x18d   :  { %v1653_v21 = vpop.f32.mrf.mxu0  ;;  %v1655_v22 = vpop.f32.mrf.mxu1 }
 0x18e   :  { %v610_v23 = vmul.f32 1.442695, %v602_v19  ;;  %v614_v24 = vmul.f32 1.442695, %v604_v20  ;;  %v603_v25 = vsub.f32 0.0, %v1653_v21  ;;  %v605_v26 = vsub.f32 0.0, %v1655_v22 }
 0x18f   :  { %v1659_v27 = vpop.f32.mrf.mxu0  ;;  %v1661_v28 = vpop.f32.mrf.mxu1 }
 0x190   :  { %1247 = vpow2.f32 %v610_v23  ;;  %v612_v29 = vmul.f32 1.442695, %v603_v25  ;;  %v616_v30 = vmul.f32 1.442695, %v605_v26  ;;  %v606_v31 = vsub.f32 0.0, %v1659_v27 }
 0x191   :  { %1249 = vpow2.f32 %v614_v24  ;;  %v608_v32 = vsub.f32 0.0, %v1661_v28  ;;  %v1665_v33 = vpop.f32.mrf.mxu0  ;;  %v1667_v34 = vpop.f32.mrf.mxu1 }
 0x192   :  { %1251 = vpow2.f32 %v612_v29  ;;  %v618_v35 = vmul.f32 1.442695, %v606_v31  ;;  %v607_v36 = vsub.f32 0.0, %v1665_v33  ;;  %v609_v37 = vsub.f32 0.0, %v1667_v34 }
 0x193   :  { %1253 = vpow2.f32 %v616_v30  ;;  %v622_v38 = vmul.f32 1.442695, %v608_v32 }
 0x194   :  { %1255 = vpow2.f32 %v618_v35  ;;  %v620_v40 = vmul.f32 1.442695, %v607_v36  ;;  %v624_v41 = vmul.f32 1.442695, %v609_v37 }
 0x195   :  { %1257 = vpow2.f32 %v622_v38 }
 0x196   :  { %1259 = vpow2.f32 %v620_v40 }
 0x197   :  { %1261 = vpow2.f32 %v624_v41 }
 0x19d   :  { %v1248_v50 = vpop.eup %1247 }
 0x19e   :  { %v1250_v51 = vpop.eup %1249  ;;  %v626_v53 = vadd.f32 1.0, %v1248_v50 }
 0x19f   :  { %v1252_v44 = vpop.eup %1251  ;;  %v628_v55 = vadd.f32 1.0, %v1250_v51 }
 0x1a0   :  { %v1254_v56 = vpop.eup %1253  ;;  %v666_v58 = vmul.f32 %v658_v52, %v626_v53  ;;  %v627_v59 = vadd.f32 1.0, %v1252_v44 }
 0x1a1   :  { %v1256_v60 = vpop.eup %1255  ;;  %v668_v62 = vmul.f32 %v660_v54, %v628_v55  ;;  %v629_v63 = vadd.f32 1.0, %v1254_v56 }
 0x1a2   :  { %v1258_v2 = vpop.eup %1257  ;;  %1263 = vrcp.f32 %v666_v58  ;;  %v667_v4 = vmul.f32 %v659_v57, %v627_v59  ;;  %v630_v5 = vadd.f32 1.0, %v1256_v60 }
 0x1a3   :  { %v1260_v6 = vpop.eup %1259  ;;  %1265 = vrcp.f32 %v668_v62  ;;  %v669_v8 = vmul.f32 %v661_v61, %v629_v63  ;;  %v632_v9 = vadd.f32 1.0, %v1258_v2 }
 0x1a4   :  { %v1262_v10 = vpop.eup %1261  ;;  %1267 = vrcp.f32 %v667_v4  ;;  %v670_v12 = vmul.f32 %v662_v3, %v630_v5  ;;  %v631_v13 = vadd.f32 1.0, %v1260_v6 }
 0x1a5   :  { %1269 = vrcp.f32 %v669_v8  ;;  %v672_v15 = vmul.f32 %v664_v7, %v632_v9  ;;  %v633_v16 = vadd.f32 1.0, %v1262_v10 }
 0x1a6   :  { %1271 = vrcp.f32 %v670_v12  ;;  %v671_v19 = vmul.f32 %v663_v11, %v631_v13 }
 0x1a7   :  { %1273 = vrcp.f32 %v672_v15  ;;  %v673_v20 = vmul.f32 %v665_v14, %v633_v16 }
 0x1a8   :  { %1275 = vrcp.f32 %v671_v19 }
 0x1a9   :  { %1277 = vrcp.f32 %v673_v20 }
 0x1af   :  { %v1264_v23 = vpop.eup %1263 }
 0x1b0   :  { %v1266_v24 = vpop.eup %1265  ;;  %v682_v39 = vmul.f32 %v1264_v23, %v1647_v17 }
 0x1b1   :  { %v1268_v25 = vpop.eup %1267  ;;  %v684_v42 = vmul.f32 %v1266_v24, %v1649_v18 }
 0x1b2   :  { %v1270_v26 = vpop.eup %1269  ;;  %v683_v36 = vmul.f32 %v1268_v25, %v1653_v21 }
 0x1b3   :  { %v1272_v29 = vpop.eup %1271  ;;  %v685_v40 = vmul.f32 %v1270_v26, %v1655_v22 }
 0x1b4   :  { %v1274_v30 = vpop.eup %1273  ;;  %v686_v32 = vmul.f32 %v1272_v29, %v1659_v27 }
 0x1b5   :  { %v1276_v31 = vpop.eup %1275  ;;  %v688_v37 = vmul.f32 %v1274_v30, %v1661_v28 }
 0x1b6   :  { %v1278_v35 = vpop.eup %1277  ;;  %v687_v38 = vmul.f32 %v1276_v31, %v1665_v33  ;;  %v690_v45 = vpack.c.bf16 %v686_v32, %v682_v39 }
 0x1b7   :  { %v689_v41 = vmul.f32 %v1278_v35, %v1667_v34  ;;  %v692_v47 = vpack.c.bf16 %v688_v37, %v684_v42 }
 0x1b8   :  { %v691_v43 = vpack.c.bf16 %v687_v38, %v683_v36 }
 0x1b9   :  { %v693_v46 = vpack.c.bf16 %v689_v41, %v685_v40 }
 0x1ba   :  { %982 = vmatprep.mubr.bf16.mxu0 %v691_v43 }
 0x1bb   :  { %1023 = vmatprep.mubr.bf16.mxu1 %v693_v46  ;;  %983 = vmatmul.mubr.bf16.vlgmr.msra.gmra.mxu0 %v690_v45 }
 0x1bc   :  { %1024 = vmatmul.mubr.bf16.vlgmr.msra.gmra.mxu1 %v692_v47 }
 0x27b   :  { %v1163_v21 = vpop.f32.mrf.mxu0 }
 0x27c   :  { %v1185_v27 = vpop.f32.mrf.mxu1 }
 0x27d   :  { %v1164_v28 = vpop.f32.mrf.mxu0 }
 0x27e   :  { %v1165_v33 = vadd.f32 %v1164_v28, %v1163_v21  ;;  %v1186_v48 = vpop.f32.mrf.mxu1 }
 0x27f   :  { %v1166_v17 = vpop.f32.mrf.mxu0  ;;  %v1187_v49 = vadd.f32 %v1186_v48, %v1185_v27 }
 0x280   :  { %v985_v22 = vadd.f32 %v1165_v33, %v1333_v0  ;;  %v1188_v34 = vpop.f32.mrf.mxu1 }
 0x281   :  { %v1167_v50 = vpop.f32.mrf.mxu0 }
 0x282   :  { %v1026_v18 = vadd.f32 %v1187_v49, %v985_v22  ;;  %v1168_v51 = vadd.f32 %v1167_v50, %v1166_v17  ;;  %v1189_v52 = vpop.f32.mrf.mxu1 }
 0x283   :  { %v1190_v44 = vadd.f32 %v1189_v52, %v1188_v34 }
 0x284   :  { %1032 = vst [vmem:[#allocation2] sm:$0xff] %v1026_v18  ;;  %v988_v53 = vadd.f32 %v1168_v51, %v1338_v1 }
 0x286   :  { %v1029_v54 = vadd.f32 %v1190_v44, %v988_v53 }
 0x288   :  { %1033 = vst [vmem:[#allocation2 + $0x8] sm:$0xff] %v1029_v54 }
 0x289   :  { %1290 = shalt.err (!%p1287_p4)
}
 0x28a   :  { %s1303_s19 = smov 128   ;;  %s1304_s1 = smov 8  }
 0x28b   :  { %1045 = dma.vmem_to_hbm [thread:$0]  %s1040_s17, 256, %s1688_s4, [#allocation3], %s1303_s19, %s1303_s19, %s1304_s1  }
 0x28c   :  { %1299 = dma.done.wait [#allocation3], 256  }
 0x28d   :  { %1300 = vsyncadd [#allocation3], 4294967040 }
 0x28e   :  { %1049 = vsyncpa [#allocation3], 1 }

</bundles_post_ra>
